<compile_context>
chip_gen: v7x
topology: tpu7x:2x2x1
jax: 0.10.0
libtpu: 0.0.40
codegen_flags: <defaults>
</compile_context>

<pallas_src>
import jax
import jax.numpy as jnp
from jax.experimental import pallas as pl
from jax.experimental.pallas import tpu as pltpu

F_OUT = 45          # module's feature width (nn.Linear(45, 45))
F_PAD = 128         # lane-dense padded feature width
TK_TARGET = 512     # reduction tile along D (sweepable per generation)


def _mm_kernel(x_ref, w_ref, b_ref, wfc_ref, bfc_ref, o_ref, acc_ref):
    """Grid = (batch_tiles [parallel], k_tiles [arbitrary])."""
    k = pl.program_id(1)

    @pl.when(k == 0)
    def _():
        acc_ref[...] = jnp.zeros_like(acc_ref)

    # Fused backbone matmul: x_tile @ (W1+W2+W3)_tile, accumulated in f32.
    acc_ref[...] += jnp.dot(x_ref[...], w_ref[...],
                            preferred_element_type=jnp.float32)

    # Epilogue (once per batch tile): fused bias, fc = nn.Linear(45, 45).
    @pl.when(k == pl.num_programs(1) - 1)
    def _():
        s = acc_ref[...] + b_ref[...]
        o_ref[...] = (jnp.dot(s, wfc_ref[...],
                              preferred_element_type=jnp.float32)
                      + bfc_ref[...])


def _round_up(x, m):
    return (x + m - 1) // m * m


def multimodal_net(x_nchw, params):
    """x_nchw: [B, C, H, W] float32.  Returns [B, 45] float32."""
    w1, b1, w2, b2, w3, b3, wfc, bfc = params
    B = x_nchw.shape[0]
    x_flat = x_nchw.reshape(B, -1).astype(jnp.float32)   # [B, D]
    D = x_flat.shape[1]

    # ---- static algebraic fusion of the three backbone heads ----
    w_sum = (w1 + w2 + w3).astype(jnp.float32)            # [D, 45]
    b_sum = (b1 + b2 + b3).astype(jnp.float32)            # [1, 45]

    # ---- padding / tiling for (8, 128)-aligned, lane-dense blocks ----
    Bp = _round_up(B, 8)
    if Bp > 128:
        TB = 128
        Bp = _round_up(Bp, TB)
    else:
        TB = Bp
    Dp = _round_up(D, 128)
    TK = min(TK_TARGET, Dp)
    Dp = _round_up(Dp, TK)

    x_p = jnp.zeros((Bp, Dp), jnp.float32).at[:B, :D].set(x_flat)
    w_p = jnp.zeros((Dp, F_PAD), jnp.float32).at[:D, :F_OUT].set(w_sum)
    b_p = jnp.zeros((1, F_PAD), jnp.float32).at[:, :F_OUT].set(b_sum)
    wfc_p = jnp.zeros((F_PAD, F_PAD), jnp.float32).at[:F_OUT, :F_OUT].set(wfc)
    bfc_p = jnp.zeros((1, F_PAD), jnp.float32).at[:, :F_OUT].set(bfc)

    n_b = Bp // TB
    n_k = Dp // TK

    # VMEM budget from the actual tile footprint (double-buffered in/out).
    vmem_bytes = 4 * (2 * (TB * TK + TK * F_PAD)      # x, W double buffers
                      + 2 * (TB * F_PAD)              # output double buffer
                      + TB * F_PAD                    # accumulator scratch
                      + F_PAD * F_PAD + 4 * F_PAD)    # fc weight + biases
    vmem_bytes = max(int(vmem_bytes * 2) + (2 << 20), 8 << 20)

    out_p = pl.pallas_call(
        _mm_kernel,
        out_shape=jax.ShapeDtypeStruct((Bp, F_PAD), jnp.float32),
        grid_spec=pltpu.PrefetchScalarGridSpec(
            num_scalar_prefetch=0,
            grid=(n_b, n_k),
            in_specs=[
                pl.BlockSpec((TB, TK), lambda i, k: (i, k)),         # x tile
                pl.BlockSpec((TK, F_PAD), lambda i, k: (k, 0)),      # folded W
                pl.BlockSpec((1, F_PAD), lambda i, k: (0, 0)),       # folded b
                pl.BlockSpec((F_PAD, F_PAD), lambda i, k: (0, 0)),   # fc W
                pl.BlockSpec((1, F_PAD), lambda i, k: (0, 0)),       # fc b
            ],
            out_specs=pl.BlockSpec((TB, F_PAD), lambda i, k: (i, 0)),
            scratch_shapes=[pltpu.VMEM((TB, F_PAD), jnp.float32)],
        ),
        compiler_params=pltpu.CompilerParams(
            dimension_semantics=("parallel", "arbitrary"),
            vmem_limit_bytes=vmem_bytes,
        ),
    )(x_p, w_p, b_p, wfc_p, bfc_p)

    return out_p[:B, :F_OUT]


def init_params(key, d_in, d_feat=F_OUT):
    """Deterministic synthetic parameters (weights stored as [in, out])."""
    ks = jax.random.split(key, 8)

    def lin(kw, kb, fan_in, fan_out):
        w = jax.random.normal(kw, (fan_in, fan_out), jnp.float32) * 0.02
        b = jax.random.normal(kb, (1, fan_out), jnp.float32) * 0.01
        return w, b

    w1, b1 = lin(ks[0], ks[1], d_in, d_feat)
    w2, b2 = lin(ks[2], ks[3], d_in, d_feat)
    w3, b3 = lin(ks[4], ks[5], d_in, d_feat)
    wfc, bfc = lin(ks[6], ks[7], d_feat, d_feat)
    return (w1, b1, w2, b2, w3, b3, wfc, bfc)


def reference(x_nchw, params):
    """Pure-JAX reference of the original (unfolded) forward pass."""
    w1, b1, w2, b2, w3, b3, wfc, bfc = params
    xf = x_nchw.reshape(x_nchw.shape[0], -1).astype(jnp.float32)
    h1 = xf @ w1 + b1
    h2 = xf @ w2 + b2
    h3 = xf @ w3 + b3
    return (h1 + h2 + h3) @ wfc + bfc


if __name__ == "__main__":
    key = jax.random.PRNGKey(0)
    kx, kp = jax.random.split(key)

    B, C, H, W = 2, 4, 16, 16
    x = jax.random.normal(kx, (B, C, H, W), jnp.float32)
    params = init_params(kp, C * H * W, F_OUT)

    out = multimodal_net(x, params)
    out = jax.block_until_ready(out)

    ref = reference(x, params)
    assert out.shape == (B, F_OUT)
    assert jnp.allclose(out, ref, atol=1e-4, rtol=1e-4)

    print("KERNEL_OK")
</pallas_src>

<mosaic_0001>
module attributes {stable_mosaic.version = 11 : i64} {
  func.func @_mm_kernel(%arg0: i32, %arg1: i32, %arg2: memref<8x512xf32, #tpu.memory_space<vmem>>, %arg3: memref<512x128xf32, #tpu.memory_space<vmem>>, %arg4: memref<1x128xf32, #tpu.memory_space<vmem>>, %arg5: memref<128x128xf32, #tpu.memory_space<vmem>>, %arg6: memref<1x128xf32, #tpu.memory_space<vmem>>, %arg7: memref<8x128xf32, #tpu.memory_space<vmem>>, %arg8: memref<8x128xf32, #tpu.memory_space<vmem>>) attributes {dimension_semantics = [#tpu.dimension_semantics<parallel>, #tpu.dimension_semantics<arbitrary>], iteration_bounds = array<i64: 1, 2>, scalar_prefetch = 0 : i64, scratch_operands = 1 : i64, tpu.core_type = #tpu.core_type<tc>, window_params = [{transform_indices = @transform_0, window_bounds = array<i64: 8, 512>}, {transform_indices = @transform_1, window_bounds = array<i64: 512, 128>}, {pipeline_mode = #tpu.pipeline_mode<synchronous>, transform_indices = @transform_2, window_bounds = array<i64: 1, 128>}, {pipeline_mode = #tpu.pipeline_mode<synchronous>, transform_indices = @transform_3, window_bounds = array<i64: 128, 128>}, {pipeline_mode = #tpu.pipeline_mode<synchronous>, transform_indices = @transform_4, window_bounds = array<i64: 1, 128>}, {transform_indices = @transform_5, window_bounds = array<i64: 8, 128>}]} {
    %c0_i32 = arith.constant 0 : i32
    %0 = arith.cmpi eq, %arg1, %c0_i32 : i32
    %1 = arith.extui %0 : i1 to i32
    %c0_i32_0 = arith.constant 0 : i32
    %2 = arith.cmpi ne, %1, %c0_i32_0 : i32
    scf.if %2 {
      %cst_9 = arith.constant 0.000000e+00 : f32
      %12 = vector.broadcast %cst_9 : f32 to vector<8x128xf32>
      %c0_10 = arith.constant 0 : index
      %c0_11 = arith.constant 0 : index
      %13 = vector.load %arg8[%c0_10, %c0_11] : memref<8x128xf32, #tpu.memory_space<vmem>>, vector<8x128xf32>
      tpu.vector_store %arg8[%c0_10, %c0_11], %12 {strides = array<i32>} : memref<8x128xf32, #tpu.memory_space<vmem>>, vector<8x128xf32>,
    } else {
    }
    %c0 = arith.constant 0 : index
    %c0_1 = arith.constant 0 : index
    %3 = vector.load %arg8[%c0, %c0_1] : memref<8x128xf32, #tpu.memory_space<vmem>>, vector<8x128xf32>
    %c0_2 = arith.constant 0 : index
    %c0_3 = arith.constant 0 : index
    %4 = vector.load %arg2[%c0_2, %c0_3] : memref<8x512xf32, #tpu.memory_space<vmem>>, vector<8x512xf32>
    %c0_4 = arith.constant 0 : index
    %c0_5 = arith.constant 0 : index
    %5 = vector.load %arg3[%c0_4, %c0_5] : memref<512x128xf32, #tpu.memory_space<vmem>>, vector<512x128xf32>
    %cst = arith.constant dense<0.000000e+00> : vector<8x128xf32>
    %6 = tpu.matmul %4, %5, %cst {dimension_numbers = #tpu.dot_dimension_numbers<[1], [0], [0], [1], [0, 0, 1, 1], [], []>} : vector<8x512xf32>, vector<512x128xf32>, vector<8x128xf32> -> vector<8x128xf32>
    %7 = arith.addf %3, %6 : vector<8x128xf32>
    %c0_6 = arith.constant 0 : index
    %c0_7 = arith.constant 0 : index
    %8 = vector.load %arg8[%c0_6, %c0_7] : memref<8x128xf32, #tpu.memory_space<vmem>>, vector<8x128xf32>
    tpu.vector_store %arg8[%c0_6, %c0_7], %7 {strides = array<i32>} : memref<8x128xf32, #tpu.memory_space<vmem>>, vector<8x128xf32>,
    %c1_i32 = arith.constant 1 : i32
    %9 = arith.cmpi eq, %arg1, %c1_i32 : i32
    %10 = arith.extui %9 : i1 to i32
    %c0_i32_8 = arith.constant 0 : i32
    %11 = arith.cmpi ne, %10, %c0_i32_8 : i32
    scf.if %11 {
      %c0_9 = arith.constant 0 : index
      %c0_10 = arith.constant 0 : index
      %12 = vector.load %arg8[%c0_9, %c0_10] : memref<8x128xf32, #tpu.memory_space<vmem>>, vector<8x128xf32>
      %c0_11 = arith.constant 0 : index
      %c0_12 = arith.constant 0 : index
      %13 = vector.load %arg4[%c0_11, %c0_12] : memref<1x128xf32, #tpu.memory_space<vmem>>, vector<1x128xf32>
      %14 = vector.broadcast %13 : vector<1x128xf32> to vector<8x128xf32>
      %15 = arith.addf %12, %14 : vector<8x128xf32>
      %c0_13 = arith.constant 0 : index
      %c0_14 = arith.constant 0 : index
      %16 = vector.load %arg5[%c0_13, %c0_14] : memref<128x128xf32, #tpu.memory_space<vmem>>, vector<128x128xf32>
      %cst_15 = arith.constant dense<0.000000e+00> : vector<8x128xf32>
      %17 = tpu.matmul %15, %16, %cst_15 {dimension_numbers = #tpu.dot_dimension_numbers<[1], [0], [0], [1], [0, 0, 1, 1], [], []>} : vector<8x128xf32>, vector<128x128xf32>, vector<8x128xf32> -> vector<8x128xf32>
      %c0_16 = arith.constant 0 : index
      %c0_17 = arith.constant 0 : index
      %18 = vector.load %arg6[%c0_16, %c0_17] : memref<1x128xf32, #tpu.memory_space<vmem>>, vector<1x128xf32>
      %19 = vector.broadcast %18 : vector<1x128xf32> to vector<8x128xf32>
      %20 = arith.addf %17, %19 : vector<8x128xf32>
      %c0_18 = arith.constant 0 : index
      %c0_19 = arith.constant 0 : index
      %21 = vector.load %arg7[%c0_18, %c0_19] : memref<8x128xf32, #tpu.memory_space<vmem>>, vector<8x128xf32>
      tpu.vector_store %arg7[%c0_18, %c0_19], %20 {strides = array<i32>} : memref<8x128xf32, #tpu.memory_space<vmem>>, vector<8x128xf32>,
    } else {
    }
    return
  }
  func.func @transform_0(%arg0: i32, %arg1: i32) -> (i32, i32) {
    %c0_i32 = arith.constant 0 : i32
    return %arg0, %arg1 : i32, i32
  }
  func.func @transform_1(%arg0: i32, %arg1: i32) -> (i32, i32) {
    %c0_i32 = arith.constant 0 : i32
    %c0_i32_0 = arith.constant 0 : i32
    return %arg1, %c0_i32 : i32, i32
  }
  func.func @transform_2(%arg0: i32, %arg1: i32) -> (i32, i32) {
    %c0_i32 = arith.constant 0 : i32
    %c0_i32_0 = arith.constant 0 : i32
    %c0_i32_1 = arith.constant 0 : i32
    return %c0_i32, %c0_i32_0 : i32, i32
  }
  func.func @transform_3(%arg0: i32, %arg1: i32) -> (i32, i32) {
    %c0_i32 = arith.constant 0 : i32
    %c0_i32_0 = arith.constant 0 : i32
    %c0_i32_1 = arith.constant 0 : i32
    return %c0_i32, %c0_i32_0 : i32, i32
  }
  func.func @transform_4(%arg0: i32, %arg1: i32) -> (i32, i32) {
    %c0_i32 = arith.constant 0 : i32
    %c0_i32_0 = arith.constant 0 : i32
    %c0_i32_1 = arith.constant 0 : i32
    return %c0_i32, %c0_i32_0 : i32, i32
  }
  func.func @transform_5(%arg0: i32, %arg1: i32) -> (i32, i32) {
    %c0_i32 = arith.constant 0 : i32
    %c0_i32_0 = arith.constant 0 : i32
    return %arg0, %c0_i32 : i32, i32
  }
}

</mosaic_0001>

<bundles_post_ra>
// kernel: tpu_custom_call.1
= control target key start
LH: loop header
LB: loop body
LE: loop exit
PB: predicated region body
PF: predicated region fallthrough
CT: control target
= control target key end

     0   :  { %10 = vsyncpa [#allocation4], 0  ;;  %s1575_s0 = inlined_call_operand.hbm [shape: f32[8,1024], index: 0, kind: input, shape index: {}]   ;;  %s1576_s1 = inlined_call_operand.hbm [shape: f32[1024,128], index: 1, kind: input, shape index: {}]   ;;  %s1577_s2 = inlined_call_operand.vmem [shape: f32[1,128], index: 2, kind: input, shape index: {}]   ;;  %s1578_s3 = inlined_call_operand.hbm [shape: f32[128,128], index: 3, kind: input, shape index: {}]   ;;  %s1579_s4 = inlined_call_operand.vmem [shape: f32[1,128], index: 4, kind: input, shape index: {}]   ;;  %s1580_s5 = inlined_call_operand.hbm [shape: f32[8,128], index: 5, kind: output, shape index: {}]  }
   0x1   :  { %12 = vsyncpa [#allocation4 + $0x1], 0 }
   0x2   :  { %13 = vsyncpa [#allocation7], 0 }
   0x3   :  { %15 = vsyncpa [#allocation7 + $0x1], 0 }
   0x4   :  { %16 = vsyncpa [#allocation5], 0  ;;  %s1270_s18 = smov 0   ;;  %s1272_s19 = smov 0  }
   0x5   :  { %s1274_s20 = smov 0   ;;  %s1276_s21 = smov 0  }
   0x6   :  { %s1278_s22 = smov 0   ;;  %s1280_s23 = smov 0  }
   0x7 LB: > { %s1299_s24 = sadd.s32 4294967295, %s1228_s23   ;;  %p56_p0 = scmp.ne.s32.totalorder %s1212_s19, %s1208_s18  ;;  %s1228_s23 = sphi %s1280_s23, %s22_s23   ;;  %s1224_s22 = sphi %s1278_s22, %s1600_s22   ;;  %s1220_s21 = sphi %s1276_s21, %s1599_s21   ;;  %s1216_s20 = sphi %s1274_s20, %s1598_s20   ;;  %s1212_s19 = sphi %s1272_s19, %s1597_s19   ;;  %s1208_s18 = sphi %s1270_s18, %s1596_s18  }
   0x8   : > { %p1581_p1 = scmp.eq.s32.totalorder %s1299_s24, 0  ;;  %p735_p2 = scmp.ge.s32.totalorder %s1228_s23, 1 }
   0x9   : > { %p182_p3 = scmp.lt.s32.totalorder %s1228_s23, 3  ;;  %s1230_s27 = smov [#allocation8]  }
   0xa   : > { %p1307_p4 = por %p1581_p1, %p56_p0  ;;  %s197_s28 = sshll.u32 %s1230_s27, 4  ;;  %s198_s28 = int_to_ptr.vmem [resolvable:$true] %s197_s28 }
   0xb   : > { %p1311_p5 = pnand %p735_p2, %p182_p3  ;;  %s31_s30 = sadd.s32 1, %s1224_s22 }
   0xc   : > { %s1586_s25 = scalar_select %p1307_p4, 1, 0 }
   0xd   : > { %s1587_s26 = scalar_select %p1311_p5, 1, 0 }
   0xe   : > { %p980_p6 = pneg %p1311_p5  ;;  %s1052_s8 = scalar_lea.hbm %s1578_s3, 2048 }
   0xf   : > { %p1053_p8 = scmp.ne.s32.totalorder %s1578_s3, %s1052_s8  ;;  %p1059_p12 = scmp.lt.u32.totalorder %s1052_s8, %s1578_s3 }
  0x10   : > { %p1319_p7 = pnand %p980_p6, %p1581_p1 }
  0x12   : > { %p1054_p9 = pneg %p1319_p7 }
  0x14   : > { %p1055_p10 = pnand %p1054_p9, %p1053_p8 }
  0x16   : > { %p1056_p11 = pneg %p1055_p10 }
  0x18   : > { %p1061_p13 = pnand %p1059_p12, %p1056_p11 }
  0x1a   : > { %1064 = shalt.err (!%p1061_p13)
}
  0x1b   : > { %s1065_s13 = scalar_lea.vmem %s198_s28, 2048  ;;  %p1073_p6 = scmp.lt.s32.totalorder %s198_s28, %s198_s28 }
  0x1c   : > { %p1066_p0 = scmp.ne.s32.totalorder %s198_s28, %s1065_s13  ;;  %p1074_p1 = scmp.lt.s32.totalorder %s1065_s13, %s1065_s13 }
  0x1e   : > { %p1068_p2 = pnand %p1066_p0, %p1054_p9  ;;  %p1075_p4 = por %p1074_p1, %p1073_p6 }
  0x20   : > { %p1069_p3 = pneg %p1068_p2 }
  0x22   : > { %p1076_p5 = pnand %p1075_p4, %p1069_p3 }
  0x24   : > { %1079 = shalt.err (!%p1076_p5)
}
  0x25   : > { %s1584_s14 = smov 128   ;;  %s1585_s15 = smov 8  }
  0x26   : > { %983 = dma.hbm_to_vmem [thread:$0]  (!%p1319_p7), %s1578_s3, 2048, %s198_s28, [#allocation7], %s1584_s14, %s1584_s14, %s1585_s15  }
  0x27   : > { %p32_p1 = scmp.ge.s32.totalorder %s31_s30, 2  ;;  %s43_s18 = sadd.s32 1, %s1216_s20 }
  0x28   : > { %p50_p4 = scmp.ne.s32.totalorder %s1216_s20, %s1212_s19  ;;  %p51_p5 = scmp.eq.s32.totalorder %s1228_s23, 0 }
  0x29   : > { %s1602_s30 = smov (%p32_p1, %s31_s30), 0  ;;  %p992_p9 = scmp.lt.s32.totalorder %s1228_s23, 2 }
  0x2a   : > { %p52_p8 = por %p51_p5, %p50_p4  ;;  %s39_s27 = ssub.s32 %s1224_s22, %s1602_s30 }
  0x2b   : > { %s1353_s6 = sand.u32 1, %s1216_s20   ;;  %p41_p10 = scmp.eq.s32.totalorder %s39_s27, 0 }
  0x2c   : > { %s738_s29 = sshll.u32 %s1353_s6, 5  ;;  %s756_s7 = sshll.u32 %s1224_s22, 9 }
  0x2d   : > { %s1358_s8 = scalar_select %p41_p10, %s1216_s20, %s43_s18  }
  0x2e   : > { %s1363_s10 = scalar_lea.hbm %s1575_s0, %s756_s7  ;;  %s218_s11 = scalar_lea.vmem [#allocation3], %s738_s29 }
  0x2f   : > { %s228_s12 = sshll.u32 %s218_s11, 4  ;;  %p1365_p7 = pnand %p992_p9, %p52_p8  ;;  %s1369_s12 = int_to_ptr.vmem [resolvable:$true] %s228_s12 }
  0x30   : > { %s741_s16 = sshll.u32 %s1353_s6, 9  ;;  %s215_s17 = scalar_lea.sflag [#allocation4], %s1353_s6 }
  0x31   : > { %s1080_s18 = scalar_lea.hbm %s1363_s10, 512  ;;  %p1082_p12 = pneg %p1365_p7 }
  0x32   : > { %p1081_p11 = scmp.ne.s32.totalorder %s1363_s10, %s1080_s18  ;;  %s1085_s7 = scalar_lea.hbm %s1575_s0, 1024 }
  0x33   : > { %p1086_p2 = scmp.lt.u32.totalorder %s1363_s10, %s1575_s0  ;;  %p1087_p3 = scmp.lt.u32.totalorder %s1085_s7, %s1080_s18 }
  0x34   : > { %p1083_p13 = pnand %p1082_p12, %p1081_p11  ;;  %p1089_p1 = scmp.lt.u32.totalorder %s1080_s18, %s1363_s10 }
  0x35   : > { %p1088_p6 = por %p1087_p3, %p1086_p2 }
  0x36   : > { %p1084_p0 = pneg %p1083_p13 }
  0x37   : > { %p1090_p4 = por %p1089_p1, %p1088_p6 }
  0x39   : > { %p1091_p5 = pnand %p1090_p4, %p1084_p0 }
  0x3b   : > { %1094 = shalt.err (!%p1091_p5)
}
  0x3c   : > { %s1095_s11 = scalar_lea.vmem %s1369_s12, 512  ;;  %s1233_s27 = smov [#allocation3]  }
  0x3d   : > { %p1096_p8 = scmp.ne.s32.totalorder %s1369_s12, %s1095_s11  ;;  %s1100_s29 = sshll.u32 %s1233_s27, 4  ;;  %s1101_s29 = int_to_ptr.vmem [resolvable:$false] %s1100_s29 }
  0x3e   : > { %s1102_s28 = scalar_lea.vmem %s1101_s29, 1024  ;;  %p1103_p11 = scmp.lt.s32.totalorder %s1369_s12, %s1101_s29 }
  0x3f   : > { %p1098_p9 = pnand %p1096_p8, %p1082_p12  ;;  %p1104_p13 = scmp.lt.s32.totalorder %s1102_s28, %s1095_s11 }
  0x41   : > { %p1099_p10 = pneg %p1098_p9  ;;  %p1105_p2 = por %p1104_p13, %p1103_p11 }
  0x43   : > { %p1106_p3 = pnand %p1105_p2, %p1099_p10 }
  0x45   : > { %1109 = shalt.err (!%p1106_p3)
}
  0x46   : > { %987 = dma.hbm_to_vmem [thread:$0]  (!%p1365_p7), %s1363_s10, 512, %s1369_s12, %s215_s17  }
  0x47   : > { %s757_s18 = sshll.u32 %s1224_s22, 13  ;;  %s239_s7 = scalar_lea.vmem [#allocation6], %s741_s16 }
  0x48   : > { %s246_s9 = sshll.u32 %s239_s7, 4  ;;  %s235_s27 = sand.u32 1, %s1228_s23   ;;  %s1401_s9 = int_to_ptr.vmem [resolvable:$true] %s246_s9 }
  0x49   : > { %s1407_s28 = scalar_lea.hbm %s1576_s1, %s757_s18  ;;  %s1409_s14 = scalar_lea.sflag [#allocation7], %s235_s27 }
  0x4a   : > { %s1110_s15 = scalar_lea.hbm %s1407_s28, 8192  ;;  %s1115_s12 = scalar_lea.hbm %s1576_s1, 16384 }
  0x4b   : > { %p1111_p0 = scmp.ne.s32.totalorder %s1407_s28, %s1110_s15  ;;  %p1116_p4 = scmp.lt.u32.totalorder %s1407_s28, %s1576_s1 }
  0x4c   : > { %p1117_p5 = scmp.lt.u32.totalorder %s1115_s12, %s1110_s15  ;;  %p1119_p9 = scmp.lt.u32.totalorder %s1110_s15, %s1407_s28 }
  0x4d   : > { %p1113_p6 = pnand %p1111_p0, %p1082_p12 }
  0x4e   : > { %p1118_p8 = por %p1117_p5, %p1116_p4 }
  0x4f   : > { %p1114_p1 = pneg %p1113_p6 }
  0x50   : > { %p1120_p10 = por %p1119_p9, %p1118_p8 }
  0x52   : > { %p1121_p11 = pnand %p1120_p10, %p1114_p1 }
  0x54   : > { %1124 = shalt.err (!%p1121_p11)
}
  0x55   : > { %s1125_s18 = scalar_lea.vmem %s1401_s9, 8192  ;;  %s1234_s7 = smov [#allocation6]  }
  0x56   : > { %p1126_p13 = scmp.ne.s32.totalorder %s1401_s9, %s1125_s18  ;;  %s1130_s27 = sshll.u32 %s1234_s7, 4  ;;  %s1131_s27 = int_to_ptr.vmem [resolvable:$false] %s1130_s27 }
  0x57   : > { %s1132_s11 = scalar_lea.vmem %s1131_s27, 16384  ;;  %p1133_p0 = scmp.lt.s32.totalorder %s1401_s9, %s1131_s27 }
  0x58   : > { %p1128_p2 = pnand %p1126_p13, %p1082_p12  ;;  %p1134_p6 = scmp.lt.s32.totalorder %s1132_s11, %s1125_s18 }
  0x5a   : > { %p1129_p3 = pneg %p1128_p2  ;;  %p1135_p4 = por %p1134_p6, %p1133_p0 }
  0x5c   : > { %p1136_p5 = pnand %p1135_p4, %p1129_p3 }
  0x5e   : > { %1139 = shalt.err (!%p1136_p5)
}
  0x5f   : > { %s1590_s15 = smov 8   ;;  %s1591_s29 = smov 128  }
  0x60   : > { %990 = dma.hbm_to_vmem [thread:$0]  (!%p1365_p7), %s1407_s28, 8192, %s1401_s9, %s1409_s14, %s1591_s29, %s1591_s29, %s1590_s15  }
  0x61   : > { %p1592_p12 = scmp.ne.s32.totalorder %s1587_s26, 0 }
  0x62   : > { %s260_s6 = sand.u32 (!%p1592_p12), 1, %s1212_s19   ;;  %p1593_p1 = scmp.ne.s32.totalorder (!%p1592_p12), %s1586_s25, 0 }
  0x63   : > { %258 = sbr.rel (%p1592_p12) target bundleno = 628 (0x274), region = 40  ;;  %s745_s10 = sshll.u32 (!%p1592_p12), %s260_s6, 5 }
  0x64   : > { %s261_s12 = scalar_lea.sflag (!%p1592_p12), [#allocation4], %s260_s6  ;;  %s1441_s16 = scalar_lea.vmem (!%p1592_p12), [#allocation3], %s745_s10 }
  0x6a   : > { %1191 = dma.done.wait (%p1593_p1), %s261_s12, 512  }
  0x6b   : > { %1193 = vsyncadd (%p1593_p1), %s261_s12, 4294966784  ;;  %s269_s13 = sand.u32 1, %s1299_s24   ;;  %s746_s17 = sshll.u32 %s260_s6, 9 }
  0x6c   : > { %s270_s14 = scalar_lea.sflag [#allocation7], %s269_s13  ;;  %s1448_s9 = scalar_lea.vmem [#allocation6], %s746_s17 }
  0x6d   : > { %1195 = dma.done.wait (%p1593_p1), %s270_s14, 8192  }
  0x6e   : > { %1197 = vsyncadd (%p1593_p1), %s270_s14, 4294959104  ;;  %p1594_p7 = scmp.eq.s32.totalorder %s1299_s24, 0 }
  0x70   : > { %1199 = dma.done.wait (%p1594_p7), [#allocation7], 2048   ;;  %p1595_p8 = pmov %p1594_p7 }
  0x71   : > { %p748_p9 = scmp.ne.s32.totalorder %s1220_s21, 0 }
  0x72   : > { %1201 = vsyncadd (%p1595_p8), [#allocation7], 4294965248  ;;  %v1235_v0 = vmov (!%p748_p9), 0.0  }
  0x73   : > { %309 = sbr.rel (%p748_p9) target bundleno = 122 (0x7a), region = 56  ;;  %310 = vst [vmem:[#allocation2] sm:$0xff] (!%p748_p9), %v1235_v0 }
  0x7a PF: > { %v332_v1 = vld [vmem:[%s1448_s9 + $0x80] sm:$0xff]  ;;  %v333_v2 = vld [vmem:[%s1448_s9 + $0x88] sm:$0xff]  ;;  %v334_v12 = vld [vmem:[%s1448_s9 + $0x90] sm:$0xff]  ;;  %p749_p10 = scmp.ne.s32.totalorder %s1220_s21, 1 }
  0x7b   : > { %v364_v3 = vld [vmem:[%s1448_s9 + $0x180] sm:$0xff]  ;;  %v880_v4 = vpack.c.bf16 %v333_v2, %v332_v1  ;;  %v365_v5 = vld [vmem:[%s1448_s9 + $0x188] sm:$0xff]  ;;  %v335_v14 = vld [vmem:[%s1448_s9 + $0x98] sm:$0xff]  ;;  %vm1237_vm0 = vmmov (!%p749_p10), 0  }
  0x7c   : > { %v316_v6 = vld [vmem:[%s1448_s9] sm:$0xff]  ;;  %v317_v7 = vld [vmem:[%s1448_s9 + $0x8] sm:$0xff]  ;;  %v912_v8 = vpack.c.bf16 %v365_v5, %v364_v3  ;;  %v366_v15 = vld [vmem:[%s1448_s9 + $0x190] sm:$0xff]  ;;  %v884_v17 = vpack.c.bf16 %v335_v14, %v334_v12 }
  0x7d   : > { %v882_v9 = vpack.c.bf16 %v317_v7, %v316_v6  ;;  %v348_v10 = vld [vmem:[%s1448_s9 + $0x100] sm:$0xff]  ;;  %v349_v11 = vld [vmem:[%s1448_s9 + $0x108] sm:$0xff]  ;;  %881 = vmatprep.subr.bf16.mxu0 %v880_v4  ;;  %v367_v16 = vld [vmem:[%s1448_s9 + $0x198] sm:$0xff] }
  0x7e   : > { %v914_v13 = vpack.c.bf16 %v349_v11, %v348_v10  ;;  %913 = vmatprep.subr.bf16.mxu1 %v912_v8  ;;  %v916_v18 = vpack.c.bf16 %v367_v16, %v366_v15  ;;  %v318_v19 = vld [vmem:[%s1448_s9 + $0x10] sm:$0xff]  ;;  %v319_v20 = vld [vmem:[%s1448_s9 + $0x18] sm:$0xff]  ;;  %v336_v24 = vld [vmem:[%s1448_s9 + $0xa0] sm:$0xff] }
  0x7f   : > { %883 = vmatpush3.bf16.msra.mxu0 %v882_v9  ;;  %v350_v21 = vld [vmem:[%s1448_s9 + $0x110] sm:$0xff]  ;;  %v886_v22 = vpack.c.bf16 %v319_v20, %v318_v19  ;;  %v351_v23 = vld [vmem:[%s1448_s9 + $0x118] sm:$0xff]  ;;  %v337_v25 = vld [vmem:[%s1448_s9 + $0xa8] sm:$0xff] }
  0x80   : > { %915 = vmatpush3.bf16.msra.mxu1 %v914_v13  ;;  %885 = vmatprep.subr.bf16.mxu0 %v884_v17  ;;  %v918_v26 = vpack.c.bf16 %v351_v23, %v350_v21  ;;  %v888_v27 = vpack.c.bf16 %v337_v25, %v336_v24  ;;  %v368_v28 = vld [vmem:[%s1448_s9 + $0x1a0] sm:$0xff]  ;;  %v369_v29 = vld [vmem:[%s1448_s9 + $0x1a8] sm:$0xff]  ;;  %v338_v36 = vld [vmem:[%s1448_s9 + $0xb0] sm:$0xff] }
  0x81   : > { %917 = vmatprep.subr.bf16.mxu1 %v916_v18  ;;  %v320_v30 = vld [vmem:[%s1448_s9 + $0x20] sm:$0xff]  ;;  %v920_v31 = vpack.c.bf16 %v369_v29, %v368_v28  ;;  %v321_v32 = vld [vmem:[%s1448_s9 + $0x28] sm:$0xff]  ;;  %v339_v37 = vld [vmem:[%s1448_s9 + $0xb8] sm:$0xff] }
  0x82   : > { %v352_v33 = vld [vmem:[%s1448_s9 + $0x120] sm:$0xff]  ;;  %v353_v34 = vld [vmem:[%s1448_s9 + $0x128] sm:$0xff]  ;;  %v890_v35 = vpack.c.bf16 %v321_v32, %v320_v30  ;;  %v370_v38 = vld [vmem:[%s1448_s9 + $0x1b0] sm:$0xff]  ;;  %v892_v40 = vpack.c.bf16 %v339_v37, %v338_v36 }
  0x83   : > { %887 = vmatpush3.bf16.msra.mxu0 %v886_v22  ;;  %v922_v39 = vpack.c.bf16 %v353_v34, %v352_v33  ;;  %v371_v41 = vld [vmem:[%s1448_s9 + $0x1b8] sm:$0xff]  ;;  %v322_v42 = vld [vmem:[%s1448_s9 + $0x30] sm:$0xff]  ;;  %v340_v47 = vld [vmem:[%s1448_s9 + $0xc0] sm:$0xff] }
  0x84   : > { %919 = vmatpush3.bf16.msra.mxu1 %v918_v26  ;;  %889 = vmatprep.subr.bf16.mxu0 %v888_v27  ;;  %v323_v43 = vld [vmem:[%s1448_s9 + $0x38] sm:$0xff]  ;;  %v924_v44 = vpack.c.bf16 %v371_v41, %v370_v38  ;;  %v354_v45 = vld [vmem:[%s1448_s9 + $0x130] sm:$0xff]  ;;  %v341_v48 = vld [vmem:[%s1448_s9 + $0xc8] sm:$0xff] }
  0x85   : > { %921 = vmatprep.subr.bf16.mxu1 %v920_v31  ;;  %v355_v46 = vld [vmem:[%s1448_s9 + $0x138] sm:$0xff]  ;;  %v372_v49 = vld [vmem:[%s1448_s9 + $0x1c0] sm:$0xff]  ;;  %v373_v50 = vld [vmem:[%s1448_s9 + $0x1c8] sm:$0xff]  ;;  %v894_v51 = vpack.c.bf16 %v323_v43, %v322_v42  ;;  %v896_v53 = vpack.c.bf16 %v341_v48, %v340_v47 }
  0x86   : > { %v926_v52 = vpack.c.bf16 %v355_v46, %v354_v45  ;;  %v324_v54 = vld [vmem:[%s1448_s9 + $0x40] sm:$0xff]  ;;  %v325_v55 = vld [vmem:[%s1448_s9 + $0x48] sm:$0xff]  ;;  %v928_v57 = vpack.c.bf16 %v373_v50, %v372_v49  ;;  %v342_v59 = vld [vmem:[%s1448_s9 + $0xd0] sm:$0xff]  ;;  %v1236_v49 = vmov (!%p749_p10), 0.0|0.0  }
  0x87   : > { %891 = vmatpush3.bf16.msra.mxu0 %v890_v35  ;;  %v356_v56 = vld [vmem:[%s1448_s9 + $0x140] sm:$0xff]  ;;  %v357_v58 = vld [vmem:[%s1448_s9 + $0x148] sm:$0xff]  ;;  %v343_v60 = vld [vmem:[%s1448_s9 + $0xd8] sm:$0xff]  ;;  %v898_v63 = vpack.c.bf16 %v325_v55, %v324_v54 }
  0x88   : > { %923 = vmatpush3.bf16.msra.mxu1 %v922_v39  ;;  %893 = vmatprep.subr.bf16.mxu0 %v892_v40  ;;  %v374_v61 = vld [vmem:[%s1448_s9 + $0x1d0] sm:$0xff]  ;;  %v375_v62 = vld [vmem:[%s1448_s9 + $0x1d8] sm:$0xff]  ;;  %v930_v0 = vpack.c.bf16 %v357_v58, %v356_v56  ;;  %v900_v1 = vpack.c.bf16 %v343_v60, %v342_v59  ;;  %v344_v7 = vld [vmem:[%s1448_s9 + $0xe0] sm:$0xff] }
  0x89   : > { %925 = vmatprep.subr.bf16.mxu1 %v924_v44  ;;  %v326_v2 = vld [vmem:[%s1448_s9 + $0x50] sm:$0xff]  ;;  %v327_v3 = vld [vmem:[%s1448_s9 + $0x58] sm:$0xff]  ;;  %v932_v5 = vpack.c.bf16 %v375_v62, %v374_v61  ;;  %v345_v8 = vld [vmem:[%s1448_s9 + $0xe8] sm:$0xff] }
  0x8a   : > { %v358_v4 = vld [vmem:[%s1448_s9 + $0x150] sm:$0xff]  ;;  %v359_v6 = vld [vmem:[%s1448_s9 + $0x158] sm:$0xff]  ;;  %v376_v9 = vld [vmem:[%s1448_s9 + $0x1e0] sm:$0xff]  ;;  %v902_v11 = vpack.c.bf16 %v327_v3, %v326_v2  ;;  %v904_v15 = vpack.c.bf16 %v345_v8, %v344_v7 }
  0x8b   : > { %895 = vmatpush3.bf16.msra.mxu0 %v894_v51  ;;  %v377_v10 = vld [vmem:[%s1448_s9 + $0x1e8] sm:$0xff]  ;;  %v328_v12 = vld [vmem:[%s1448_s9 + $0x60] sm:$0xff]  ;;  %v934_v14 = vpack.c.bf16 %v359_v6, %v358_v4  ;;  %v315_v18 = vld [vmem:[%s1441_s16 + $0x18] sm:$0xff] }
  0x8c   : > { %927 = vmatpush3.bf16.msra.mxu1 %v926_v52  ;;  %897 = vmatprep.subr.bf16.mxu0 %v896_v53  ;;  %v329_v13 = vld [vmem:[%s1448_s9 + $0x68] sm:$0xff]  ;;  %v360_v16 = vld [vmem:[%s1448_s9 + $0x160] sm:$0xff]  ;;  %v936_v19 = vpack.c.bf16 %v377_v10, %v376_v9  ;;  %v346_v21 = vld [vmem:[%s1448_s9 + $0xf0] sm:$0xff]  ;;  %v1238_v52 = vmov (!%p749_p10), 0.0  }
  0x8d   : > { %929 = vmatprep.subr.bf16.mxu1 %v928_v57  ;;  %v313_v17 = vld [vmem:[%s1441_s16 + $0x8] sm:$0xff]  ;;  %v347_v22 = vld [vmem:[%s1448_s9 + $0xf8] sm:$0xff]  ;;  %v378_v23 = vld [vmem:[%s1448_s9 + $0x1f0] sm:$0xff]  ;;  %514 = vmatprep.mubr.f32.mxu1 %v315_v18  ;;  %v906_v25 = vpack.c.bf16 %v329_v13, %v328_v12 }
  0x8e   : > { %v361_v20 = vld [vmem:[%s1448_s9 + $0x168] sm:$0xff]  ;;  %444 = vmatprep.mubr.f32.mxu0 %v313_v17  ;;  %v379_v24 = vld [vmem:[%s1448_s9 + $0x1f8] sm:$0xff]  ;;  %v908_v27 = vpack.c.bf16 %v347_v22, %v346_v21  ;;  %v330_v28 = vld [vmem:[%s1448_s9 + $0x70] sm:$0xff] }
  0x8f   : > { %899 = vmatpush3.bf16.msra.mxu0 %v898_v63  ;;  %v938_v26 = vpack.c.bf16 %v361_v20, %v360_v16  ;;  %v331_v29 = vld [vmem:[%s1448_s9 + $0x78] sm:$0xff]  ;;  %v940_v30 = vpack.c.bf16 %v379_v24, %v378_v23  ;;  %v362_v31 = vld [vmem:[%s1448_s9 + $0x170] sm:$0xff]  ;;  %v312_v35 = vld [vmem:[%s1441_s16] sm:$0xff] }
  0x90   : > { %931 = vmatpush3.bf16.msra.mxu1 %v930_v0  ;;  %901 = vmatprep.subr.bf16.mxu0 %v900_v1  ;;  %v363_v32 = vld [vmem:[%s1448_s9 + $0x178] sm:$0xff]  ;;  %v910_v33 = vpack.c.bf16 %v331_v29, %v330_v28  ;;  %v314_v36 = vld [vmem:[%s1441_s16 + $0x10] sm:$0xff]  ;;  %v535_v46 = vld [vmem:[#allocation8] sm:$0xff] (!%p749_p10) }
  0x91   : > { %933 = vmatprep.subr.bf16.mxu1 %v932_v5  ;;  %v942_v34 = vpack.c.bf16 %v363_v32, %v362_v31  ;;  %v311_v43 = vld [vmem:[#allocation2] sm:$0xff]  ;;  %v536_v47 = vld [vmem:[#allocation8 + $0x8] sm:$0xff] (!%p749_p10)  ;;  %v537_v48 = vld [vmem:[#allocation8 + $0x10] sm:$0xff] (!%p749_p10) }
  0x92   : > { %v945_v50 = vpack.c.bf16 (!%p749_p10), %v536_v47, %v535_v46  ;;  %v538_v51 = vld [vmem:[#allocation8 + $0x18] sm:$0xff] (!%p749_p10)  ;;  %v539_v54 = vld [vmem:[#allocation8 + $0x20] sm:$0xff] (!%p749_p10)  ;;  %v540_v55 = vld [vmem:[#allocation8 + $0x28] sm:$0xff] (!%p749_p10) }
  0x93   : > { %903 = vmatpush3.bf16.msra.mxu0 %v902_v11  ;;  %v948_v53 = vpack.c.bf16 (!%p749_p10), %v538_v51, %v537_v48  ;;  %v951_v56 = vpack.c.bf16 (!%p749_p10), %v540_v55, %v539_v54  ;;  %v541_v57 = vld [vmem:[#allocation8 + $0x30] sm:$0xff] (!%p749_p10)  ;;  %v542_v58 = vld [vmem:[#allocation8 + $0x38] sm:$0xff] (!%p749_p10)  ;;  %v543_v60 = vld [vmem:[#allocation8 + $0x40] sm:$0xff] (!%p749_p10) }
  0x94   : > { %935 = vmatpush3.bf16.msra.mxu1 %v934_v14  ;;  %905 = vmatprep.subr.bf16.mxu0 %v904_v15  ;;  %v954_v59 = vpack.c.bf16 (!%p749_p10), %v542_v58, %v541_v57  ;;  %v544_v61 = vld [vmem:[#allocation8 + $0x48] sm:$0xff] (!%p749_p10)  ;;  %v545_v63 = vld [vmem:[#allocation8 + $0x50] sm:$0xff] (!%p749_p10)  ;;  %v546_v0 = vld [vmem:[#allocation8 + $0x58] sm:$0xff] (!%p749_p10) }
  0x95   : > { %937 = vmatprep.subr.bf16.mxu1 %v936_v19  ;;  %v957_v62 = vpack.c.bf16 (!%p749_p10), %v544_v61, %v543_v60  ;;  %v960_v1 = vpack.c.bf16 (!%p749_p10), %v546_v0, %v545_v63  ;;  %v547_v2 = vld [vmem:[#allocation8 + $0x60] sm:$0xff] (!%p749_p10)  ;;  %v548_v3 = vld [vmem:[#allocation8 + $0x68] sm:$0xff] (!%p749_p10)  ;;  %v549_v5 = vld [vmem:[#allocation8 + $0x70] sm:$0xff] (!%p749_p10) }
  0x96   : > { %v963_v4 = vpack.c.bf16 (!%p749_p10), %v548_v3, %v547_v2  ;;  %v550_v6 = vld [vmem:[#allocation8 + $0x78] sm:$0xff] (!%p749_p10) }
  0x97   : > { %907 = vmatpush3.bf16.msra.mxu0 %v906_v25  ;;  %v966_v7 = vpack.c.bf16 (!%p749_p10), %v550_v6, %v549_v5  ;;  %v750_v9 = vld [vmem:[%s1577_s2] ss:$0 sm:$0xff] (!%p749_p10) }
  0x98   : > { %939 = vmatpush3.bf16.msra.mxu1 %v938_v26  ;;  %909 = vmatprep.subr.bf16.mxu0 %v908_v27  ;;  %v751_v11 = vld [vmem:[%s1579_s4] ss:$0 sm:$0xff] (!%p749_p10) }
  0x99   : > { %941 = vmatprep.subr.bf16.mxu1 %v940_v30 }
  0x9b   : > { %911 = vmatpush3.bf16.msra.mxu0 %v910_v33 }
  0x9c   : > { %943 = vmatpush3.bf16.msra.mxu1 %v942_v34  ;;  %944 = vmatprep.subr.bf16.mxu0 (!%p749_p10), %v1236_v49 }
  0x9e   : > { %445 = vmatmul.mubr.f32.vlgmr.msra.gmra.mrb[0].mxu0 %v312_v35 }
  0x9f   : > { %515 = vmatmul.mubr.f32.vlgmr.msra.gmra.mrb[0].mxu1 %v314_v36  ;;  %877 = vmatprep.mubr.msk.f32.mxu0 (!%p749_p10), %vm1237_vm0, %v1238_v52 }
  0xa0   : > { %946 = vmatpush3.bf16.msra.mxu0 (!%p749_p10), %v945_v50 }
  0xa1   : > { %947 = vmatprep.subr.bf16.mxu0 (!%p749_p10), %v1236_v49 }
  0xa4   : > { %949 = vmatpush3.bf16.msra.mxu0 (!%p749_p10), %v948_v53 }
  0xa5   : > { %950 = vmatprep.subr.bf16.mxu0 (!%p749_p10), %v1236_v49 }
  0xa8   : > { %952 = vmatpush3.bf16.msra.mxu0 (!%p749_p10), %v951_v56 }
  0xa9   : > { %953 = vmatprep.subr.bf16.mxu0 (!%p749_p10), %v1236_v49 }
  0xac   : > { %955 = vmatpush3.bf16.msra.mxu0 (!%p749_p10), %v954_v59 }
  0xad   : > { %956 = vmatprep.subr.bf16.mxu0 (!%p749_p10), %v1236_v49 }
  0xb0   : > { %958 = vmatpush3.bf16.msra.mxu0 (!%p749_p10), %v957_v62 }
  0xb1   : > { %959 = vmatprep.subr.bf16.mxu0 (!%p749_p10), %v1236_v49 }
  0xb4   : > { %961 = vmatpush3.bf16.msra.mxu0 (!%p749_p10), %v960_v1 }
  0xb5   : > { %962 = vmatprep.subr.bf16.mxu0 (!%p749_p10), %v1236_v49 }
  0xb8   : > { %964 = vmatpush3.bf16.msra.mxu0 (!%p749_p10), %v963_v4 }
  0xb9   : > { %965 = vmatprep.subr.bf16.mxu0 (!%p749_p10), %v1236_v49 }
  0xbc   : > { %967 = vmatpush3.bf16.msra.mxu0 (!%p749_p10), %v966_v7 }
 0x171   : > { %v790_v37 = vpop.f32.mrb[0].mxu0 }
 0x172   : > { %v825_v38 = vpop.f32.mrb[0].mxu1  ;;  %v791_v39 = vpop.f32.mrb[1].mxu0 }
 0x173   : > { %v792_v40 = vadd.f32 %v791_v39, %v790_v37  ;;  %v826_v41 = vpop.f32.mrb[1].mxu1 }
 0x174   : > { %v827_v42 = vadd.f32 %v826_v41, %v825_v38  ;;  %525 = sbr.rel (%p749_p10) target bundleno = 603 (0x25b), region = 60 }
 0x176   : > { %v517_v44 = vadd.f32 %v827_v42, %v792_v40 }
 0x178   : > { %v520_v45 = vadd.f32 %v517_v44, %v311_v43 }
 0x17a   : > { %521 = vst [vmem:[#allocation2] sm:$0xff] %v520_v45 }
 0x181   : > { %v526_v8 = vld [vmem:[#allocation2] sm:$0xff] }
 0x182   : > { %v534_v10 = vadd.f32 %v750_v9, %v526_v8 }
 0x184   : > { %878 = vmatmul.mubr.f32.vlgmr.msra.gmra.mrb[0].mxu0 %v534_v10 }
 0x257   : > { %v624_v12 = vpop.f32.mrb[0].mxu0 }
 0x258   : > { %v625_v13 = vadd.f32 %v751_v11, %v624_v12  ;;  %v879_v14 = vpop.f32.mrb[1].mxu0 }
 0x25a   : > { %628 = vst [vmem:[#allocation9] sm:$0xff] %v625_v13 }
 0x25b PF: > { %p994_p11 = scmp.eq.s32.totalorder %s1299_s24, 1  ;;  %s1239_s18 = smov [#allocation9]  }
 0x25c   : > { %s638_s7 = sshll.u32 %s1239_s18, 4  ;;  %s639_s7 = int_to_ptr.vmem [resolvable:$true] %s638_s7 }
 0x25d   : > { %s1140_s27 = scalar_lea.vmem %s639_s7, 128  ;;  %p1147_p0 = scmp.lt.s32.totalorder %s639_s7, %s639_s7 }
 0x25e   : > { %p1141_p13 = scmp.ne.s32.totalorder %s639_s7, %s1140_s27  ;;  %p1148_p6 = scmp.lt.s32.totalorder %s1140_s27, %s1140_s27 }
 0x260   : > { %p1142_p2 = pnand %p1141_p13, %p994_p11  ;;  %p1149_p4 = por %p1148_p6, %p1147_p0 }
 0x262   : > { %p1143_p3 = pneg %p1142_p2 }
 0x264   : > { %p1150_p5 = pnand %p1149_p4, %p1143_p3 }
 0x266   : > { %1153 = shalt.err (!%p1150_p5)
}
 0x267   : > { %s1154_s29 = scalar_lea.hbm %s1580_s5, 128 }
 0x268   : > { %p1155_p12 = scmp.ne.s32.totalorder %s1580_s5, %s1154_s29  ;;  %p1160_p8 = scmp.lt.u32.totalorder %s1154_s29, %s1580_s5 }
 0x26a   : > { %p1156_p1 = pnand %p1155_p12, %p994_p11 }
 0x26c   : > { %p1157_p7 = pneg %p1156_p1 }
 0x26e   : > { %p1162_p9 = pnand %p1160_p8, %p1157_p7 }
 0x270   : > { %1165 = shalt.err (!%p1162_p9)
}
 0x271   : > { %977 = dma.vmem_to_hbm [thread:$0]  (%p994_p11), %s639_s7, 128, %s1580_s5, [#allocation5]  }
 0x272   : > { %1203 = dma.done.wait (%p994_p11), [#allocation5], 128  }
 0x273   : > { %1205 = vsyncadd (%p994_p11), [#allocation5], 4294967168 }
 0x274 PF: > { %s22_s23 = sadd.s32 1, %s1228_s23   ;;  %s1596_s18 = smov %s1212_s19 }
 0x275   : > { %p19_p10 = scmp.ge.s32.totalorder %s22_s23, 4   ;;  %s1597_s19 = smov %s1216_s20 }
 0x276   : > { %s1598_s20 = smov %s1358_s8  ;;  %s1599_s21 = smov %s1224_s22 }
 0x277   : > { %s1600_s22 = smov %s1602_s30  ;;  %21 = sbr.rel (!%p19_p10) target bundleno = 7 (0x7), region = 103 }
 0x27e   :  { %651 = vsyncpa [#allocation4], 1 }
 0x27f   :  { %653 = vsyncpa [#allocation4 + $0x1], 1 }
 0x280   :  { %654 = vsyncpa [#allocation7], 1 }
 0x281   :  { %656 = vsyncpa [#allocation7 + $0x1], 1 }
 0x282   :  { %657 = vsyncpa [#allocation5], 1 }
 0x283   :  { %659 = vsyncpa [#allocation5 + $0x1], 1 }

</bundles_post_ra>
